<compile_context>
chip_gen: v7x
topology: tpu7x:2x2x1
jax: 0.10.0
libtpu: 0.0.40
codegen_flags: <defaults>
</compile_context>

<pallas_src>
import jax
import jax.numpy as jnp
from jax import lax
from jax.experimental import pallas as pl
from jax.experimental.pallas import tpu as pltpu

NEG_SLOPE = 0.01      # F.leaky_relu default
P_DROP = 0.2          # F.dropout p
BN_EPS = 1e-5         # nn.BatchNorm1d default
LANE = 128
SUBLANE = 8

VMEM_TILE_BUDGET = 16 * 1024 * 1024     # double-buffered per-tile input/output budget
RESIDENT_BUDGET = 12 * 1024 * 1024      # max VMEM for the resident hidden slab (v7x-safe)
VMEM_LIMIT = 32 * 1024 * 1024


def _round_up(n, m):
    return ((n + m - 1) // m) * m


def _leaky_relu(x):
    return jnp.where(x > 0, x, NEG_SLOPE * x)


def _make_kernel(resident, TB, inv_n):
    inv_keep = 1.0 / (1.0 - P_DROP)

    def kernel(x_ref, bits_ref, lm_ref, w_ref, b_ref, g_ref, bt_ref, o_ref,
               sum_ref, sumsq_ref, scale_ref, shift_ref, *h_scr):
        p = pl.program_id(0)      # 0: accumulate batch stats, 1: normalize & write
        i = pl.program_id(1)      # batch tile (fastest-varying grid axis)

        def compute_h():
            # fc1 + leaky_relu + dropout for this batch tile.
            h = jnp.dot(x_ref[...], w_ref[...], preferred_element_type=jnp.float32)
            h = _leaky_relu(h + b_ref[...])
            # Expand the per-row packed keep bits: lane j keeps iff bit (j & 31) set.
            # Lanes >= 32 carry garbage keep values but h is exactly 0 there (zero-
            # padded W1 columns / bias), and padded rows have bits == 0 -> dropped.
            bits = jnp.broadcast_to(bits_ref[...], h.shape)        # (TB,1) -> (TB,128)
            lmask = jnp.broadcast_to(lm_ref[...], h.shape)         # (1,128) -> (TB,128)
            keep = (bits & lmask) != 0
            return jnp.where(keep, h * inv_keep, 0.0)

        @pl.when(jnp.logical_and(p == 0, i == 0))
        def _init():
            sum_ref[...] = jnp.zeros_like(sum_ref)
            sumsq_ref[...] = jnp.zeros_like(sumsq_ref)

        @pl.when(p == 0)
        def _accumulate():
            h = compute_h()
            sum_ref[...] = sum_ref[...] + jnp.sum(h, axis=0, keepdims=True)
            # Variance via E[h^2]-mean^2 (single reduction per tile); clamped >= 0.
            # NOTE: can lose precision vs (h-mean)^2 when |mean| >> std.
            sumsq_ref[...] = sumsq_ref[...] + jnp.sum(h * h, axis=0, keepdims=True)
            if resident:
                off = pl.multiple_of(i * TB, SUBLANE)
                h_scr[0][pl.ds(off, TB), :] = h

        @pl.when(jnp.logical_and(p == 1, i == 0))
        def _finalize():
            mean = sum_ref[...] * inv_n
            var = jnp.maximum(sumsq_ref[...] * inv_n - mean * mean, 0.0)  # biased var
            rstd = lax.rsqrt(var + BN_EPS)
            scale_ref[...] = g_ref[...] * rstd
            shift_ref[...] = bt_ref[...] - mean * scale_ref[...]

        @pl.when(p == 1)
        def _apply():
            if resident:
                off = pl.multiple_of(i * TB, SUBLANE)
                h = h_scr[0][pl.ds(off, TB), :]
            else:
                h = compute_h()
            o_ref[...] = h * scale_ref[...] + shift_ref[...]

    return kernel


def feature_extractor_forward(x, rand, params, *, tile_batch=2048, force_resident=None):
    """x: (B, in_dim) f32, rand: (B, 32) dropout uniforms in [0,1) -> (B, 32) f32."""
    w1, b1, gamma, beta = params
    B, in_dim = x.shape
    H = w1.shape[1]                                  # 32 (fixed by the module)
    assert H <= 32, "keep-bit packing assumes fc1 output width <= 32"
    H_PAD = _round_up(H, LANE)                       # 128, lane-dense output

    # --- batch tiling: big tiles amortize the ~0.35us/step pipeline overhead ---
    per_row_bytes = 4 * (in_dim + H_PAD + 1)         # x + out + packed bits, f32/int32
    tb_cap = max(SUBLANE,
                 (VMEM_TILE_BUDGET // (2 * per_row_bytes)) // SUBLANE * SUBLANE)
    TB = _round_up(min(tile_batch, tb_cap, _round_up(B, SUBLANE)), SUBLANE)
    B_PAD = _round_up(B, TB)
    NT = B_PAD // TB

    # Keep the post-dropout hidden slab resident in VMEM when it fits -> pass 1
    # reads it back instead of recomputing fc1/leaky_relu/dropout.
    hidden_bytes = B_PAD * H_PAD * 4
    resident = (hidden_bytes <= RESIDENT_BUDGET) if force_resident is None \
        else bool(force_resident)

    # --- wrapper-side data prep (all small) ---
    xp = jnp.zeros((B_PAD, in_dim), jnp.float32).at[:B].set(x.astype(jnp.float32))

    # Pack the 32 per-feature keep decisions of each row into one uint32 word.
    keep = rand >= P_DROP                                               # (B, H) bool
    weights_u32 = jnp.left_shift(jnp.uint32(1), jnp.arange(H, dtype=jnp.uint32))
    packed = jnp.sum(jnp.where(keep, weights_u32[None, :], jnp.uint32(0)),
                     axis=1, dtype=jnp.uint32)                          # (B,)
    bits = jnp.zeros((B_PAD, 1), jnp.int32).at[:B, 0].set(
        lax.bitcast_convert_type(packed, jnp.int32))                    # pad rows -> 0

    # Constant per-lane bit masks (1 << (lane & 31)).
    lane = jnp.arange(H_PAD, dtype=jnp.uint32) & jnp.uint32(31)
    lm = lax.bitcast_convert_type(jnp.left_shift(jnp.uint32(1), lane),
                                  jnp.int32).reshape(1, H_PAD)

    # Parameters: lane-pad to 128 with zeros (padded output lanes stay exactly 0).
    w1p = jnp.zeros((in_dim, H_PAD), jnp.float32).at[:, :H].set(w1)
    b1p = jnp.zeros((1, H_PAD), jnp.float32).at[0, :H].set(b1)
    gp = jnp.zeros((1, H_PAD), jnp.float32).at[0, :H].set(gamma)
    bp = jnp.zeros((1, H_PAD), jnp.float32).at[0, :H].set(beta)

    kernel = _make_kernel(resident, TB, 1.0 / B)

    if resident:
        # During pass 1 the tile data is unused -> pin the index so only one extra
        # block is ever fetched (Pallas skips the DMA when the index is unchanged).
        xmap = lambda p, i: (i * (1 - p), 0)
    else:
        xmap = lambda p, i: (i, 0)
    const_map = lambda p, i: (0, 0)

    scratch = [pltpu.VMEM((1, H_PAD), jnp.float32)] * 4
    if resident:
        scratch = scratch + [pltpu.VMEM((B_PAD, H_PAD), jnp.float32)]

    passes = 1 if resident else 2
    flops = passes * 2 * B_PAD * in_dim * H_PAD + 12 * B_PAD * H_PAD
    bytes_accessed = (passes * B_PAD * (in_dim * 4 + 4)       # x + packed bits reads
                      + B_PAD * H_PAD * 4                     # single output writeback
                      + in_dim * H_PAD * 4 + 5 * H_PAD * 4)   # weights / vectors

    out = pl.pallas_call(
        kernel,
        out_shape=jax.ShapeDtypeStruct((B_PAD, H_PAD), jnp.float32),
        grid_spec=pltpu.PrefetchScalarGridSpec(
            num_scalar_prefetch=0,
            grid=(2, NT),                             # last axis fastest: stats pass first
            in_specs=[
                pl.BlockSpec((TB, in_dim), xmap),              # x tile (row-padded only)
                pl.BlockSpec((TB, 1), xmap),                   # packed dropout keep bits
                pl.BlockSpec((1, H_PAD), const_map),           # per-lane bit masks
                pl.BlockSpec((in_dim, H_PAD), const_map),      # W1 (resident)
                pl.BlockSpec((1, H_PAD), const_map),           # b1
                pl.BlockSpec((1, H_PAD), const_map),           # gamma
                pl.BlockSpec((1, H_PAD), const_map),           # beta
            ],
            # Index constant during pass 0 -> no throwaway pass-0 writebacks.
            out_specs=pl.BlockSpec((TB, H_PAD), lambda p, i: (i * p, 0)),
            scratch_shapes=scratch,
        ),
        compiler_params=pltpu.CompilerParams(
            # Both axes sequential: batch tiles share the stats scratch, and the pass
            # axis orders "accumulate" strictly before "finalize/apply".
            dimension_semantics=("arbitrary", "arbitrary"),
            vmem_limit_bytes=VMEM_LIMIT,
        ),
        cost_estimate=pl.CostEstimate(
            flops=flops, transcendentals=H_PAD, bytes_accessed=bytes_accessed),
    )(xp, bits, lm, w1p, b1p, gp, bp)

    return out[:B, :H]


def init_params(key, input_dim):
    """Deterministic synthetic parameters (PyTorch-like fan-in init for fc1)."""
    ks = jax.random.split(key, 4)
    bound = float(1.0 / (input_dim ** 0.5))
    w1 = jax.random.uniform(ks[0], (input_dim, 32), jnp.float32, -bound, bound)
    b1 = jax.random.uniform(ks[1], (32,), jnp.float32, -bound, bound)
    # PyTorch BatchNorm1d inits weight=1 / bias=0; randomize a little so the affine
    # path is actually exercised by the correctness check.
    gamma = jax.random.uniform(ks[2], (32,), jnp.float32, 0.5, 1.5)
    beta = jax.random.uniform(ks[3], (32,), jnp.float32, -0.5, 0.5)
    return (w1, b1, gamma, beta)


def reference_forward(x, rand, params):
    """Pure-JAX reference with identical semantics (same dropout keep decisions)."""
    w1, b1, gamma, beta = params
    h = _leaky_relu(x @ w1 + b1)
    h = jnp.where(rand >= P_DROP, h * (1.0 / (1.0 - P_DROP)), 0.0)
    mean = jnp.mean(h, axis=0, keepdims=True)
    var = jnp.mean((h - mean) ** 2, axis=0, keepdims=True)   # biased (training-mode BN)
    return (h - mean) * lax.rsqrt(var + BN_EPS) * gamma + beta


if __name__ == "__main__":
    # hidden_dim / proj_dim of the module are unused on the default forward path.
    B, IN_DIM = 20, 16

    key = jax.random.PRNGKey(0)
    kx, kr, kp = jax.random.split(key, 3)
    x = jax.random.normal(kx, (B, IN_DIM), jnp.float32)
    rand = jax.random.uniform(kr, (B, 32), jnp.float32)      # dropout uniforms
    params = init_params(kp, IN_DIM)

    ref = reference_forward(x, rand, params)

    # tile_batch=8 -> 3 batch tiles (incl. a ragged last tile): exercises multi-tile
    # stat accumulation with the hidden slab resident in VMEM (default path).
    out_res = jax.block_until_ready(
        feature_extractor_forward(x, rand, params, tile_batch=8))
    # Same tiling, streaming/recompute fallback (used when the slab would not fit VMEM).
    out_rec = jax.block_until_ready(
        feature_extractor_forward(x, rand, params, tile_batch=8, force_resident=False))
    # Default large tile -> single batch tile.
    out_one = jax.block_until_ready(feature_extractor_forward(x, rand, params))

    for out in (out_res, out_rec, out_one):
        assert out.shape == (B, 32)
        assert jnp.allclose(out, ref, atol=1e-4, rtol=1e-4), "mismatch vs reference"

    print("KERNEL_OK")
</pallas_src>

<mosaic_0001>
module attributes {stable_mosaic.version = 11 : i64} {
  func.func @kernel(%arg0: i32, %arg1: i32, %arg2: memref<8x16xf32, #tpu.memory_space<vmem>>, %arg3: memref<8x1xi32, #tpu.memory_space<vmem>>, %arg4: memref<1x128xi32, #tpu.memory_space<vmem>>, %arg5: memref<16x128xf32, #tpu.memory_space<vmem>>, %arg6: memref<1x128xf32, #tpu.memory_space<vmem>>, %arg7: memref<1x128xf32, #tpu.memory_space<vmem>>, %arg8: memref<1x128xf32, #tpu.memory_space<vmem>>, %arg9: memref<8x128xf32, #tpu.memory_space<vmem>>, %arg10: memref<1x128xf32, #tpu.memory_space<vmem>>, %arg11: memref<1x128xf32, #tpu.memory_space<vmem>>, %arg12: memref<1x128xf32, #tpu.memory_space<vmem>>, %arg13: memref<1x128xf32, #tpu.memory_space<vmem>>, %arg14: memref<24x128xf32, #tpu.memory_space<vmem>>) attributes {dimension_semantics = [#tpu.dimension_semantics<arbitrary>, #tpu.dimension_semantics<arbitrary>], iteration_bounds = array<i64: 2, 3>, scalar_prefetch = 0 : i64, scratch_operands = 5 : i64, tpu.core_type = #tpu.core_type<tc>, window_params = [{transform_indices = @transform_0, window_bounds = array<i64: 8, 16>}, {transform_indices = @transform_1, window_bounds = array<i64: 8, 1>}, {pipeline_mode = #tpu.pipeline_mode<synchronous>, transform_indices = @transform_2, window_bounds = array<i64: 1, 128>}, {pipeline_mode = #tpu.pipeline_mode<synchronous>, transform_indices = @transform_3, window_bounds = array<i64: 16, 128>}, {pipeline_mode = #tpu.pipeline_mode<synchronous>, transform_indices = @transform_4, window_bounds = array<i64: 1, 128>}, {pipeline_mode = #tpu.pipeline_mode<synchronous>, transform_indices = @transform_5, window_bounds = array<i64: 1, 128>}, {pipeline_mode = #tpu.pipeline_mode<synchronous>, transform_indices = @transform_6, window_bounds = array<i64: 1, 128>}, {transform_indices = @transform_7, window_bounds = array<i64: 8, 128>}]} {
    %c0_i32 = arith.constant 0 : i32
    %0 = arith.cmpi eq, %arg0, %c0_i32 : i32
    %c0_i32_0 = arith.constant 0 : i32
    %1 = arith.cmpi eq, %arg1, %c0_i32_0 : i32
    %2 = arith.andi %0, %1 : i1
    %3 = arith.extui %2 : i1 to i32
    %c0_i32_1 = arith.constant 0 : i32
    %4 = arith.cmpi ne, %3, %c0_i32_1 : i32
    scf.if %4 {
      %cst = arith.constant 0.000000e+00 : f32
      %16 = vector.broadcast %cst : f32 to vector<1x128xf32>
      %c0 = arith.constant 0 : index
      %c0_8 = arith.constant 0 : index
      %17 = vector.load %arg10[%c0, %c0_8] : memref<1x128xf32, #tpu.memory_space<vmem>>, vector<1x128xf32>
      tpu.vector_store %arg10[%c0, %c0_8], %16 {strides = array<i32>} : memref<1x128xf32, #tpu.memory_space<vmem>>, vector<1x128xf32>,
      %cst_9 = arith.constant 0.000000e+00 : f32
      %18 = vector.broadcast %cst_9 : f32 to vector<1x128xf32>
      %c0_10 = arith.constant 0 : index
      %c0_11 = arith.constant 0 : index
      %19 = vector.load %arg11[%c0_10, %c0_11] : memref<1x128xf32, #tpu.memory_space<vmem>>, vector<1x128xf32>
      tpu.vector_store %arg11[%c0_10, %c0_11], %18 {strides = array<i32>} : memref<1x128xf32, #tpu.memory_space<vmem>>, vector<1x128xf32>,
    } else {
    }
    %c0_i32_2 = arith.constant 0 : i32
    %5 = arith.cmpi eq, %arg0, %c0_i32_2 : i32
    %6 = arith.extui %5 : i1 to i32
    %c0_i32_3 = arith.constant 0 : i32
    %7 = arith.cmpi ne, %6, %c0_i32_3 : i32
    scf.if %7 {
      %c0 = arith.constant 0 : index
      %c0_8 = arith.constant 0 : index
      %16 = vector.load %arg2[%c0, %c0_8] : memref<8x16xf32, #tpu.memory_space<vmem>>, vector<8x16xf32>
      %c0_9 = arith.constant 0 : index
      %c0_10 = arith.constant 0 : index
      %17 = vector.load %arg5[%c0_9, %c0_10] : memref<16x128xf32, #tpu.memory_space<vmem>>, vector<16x128xf32>
      %cst = arith.constant dense<0.000000e+00> : vector<8x128xf32>
      %18 = tpu.matmul %16, %17, %cst {dimension_numbers = #tpu.dot_dimension_numbers<[1], [0], [0], [1], [0, 0, 1, 1], [], []>} : vector<8x16xf32>, vector<16x128xf32>, vector<8x128xf32> -> vector<8x128xf32>
      %c0_11 = arith.constant 0 : index
      %c0_12 = arith.constant 0 : index
      %19 = vector.load %arg6[%c0_11, %c0_12] : memref<1x128xf32, #tpu.memory_space<vmem>>, vector<1x128xf32>
      %20 = vector.broadcast %19 : vector<1x128xf32> to vector<8x128xf32>
      %21 = arith.addf %18, %20 : vector<8x128xf32>
      %cst_13 = arith.constant 0.000000e+00 : f32
      %22 = vector.broadcast %cst_13 : f32 to vector<8x128xf32>
      %23 = arith.cmpf ogt, %21, %22 : vector<8x128xf32>
      %cst_14 = arith.constant 0.00999999977 : f32
      %24 = vector.broadcast %cst_14 : f32 to vector<8x128xf32>
      %25 = arith.mulf %24, %21 : vector<8x128xf32>
      %26 = arith.select %23, %21, %25 : vector<8x128xi1>, vector<8x128xf32>
      %c0_15 = arith.constant 0 : index
      %c0_16 = arith.constant 0 : index
      %27 = vector.load %arg3[%c0_15, %c0_16] : memref<8x1xi32, #tpu.memory_space<vmem>>, vector<8x1xi32>
      %28 = vector.shape_cast %27 : vector<8x1xi32> to vector<8x1xi32>
      %29 = vector.broadcast %28 : vector<8x1xi32> to vector<8x128xi32>
      %c0_17 = arith.constant 0 : index
      %c0_18 = arith.constant 0 : index
      %30 = vector.load %arg4[%c0_17, %c0_18] : memref<1x128xi32, #tpu.memory_space<vmem>>, vector<1x128xi32>
      %31 = vector.shape_cast %30 : vector<1x128xi32> to vector<1x128xi32>
      %32 = vector.broadcast %31 : vector<1x128xi32> to vector<8x128xi32>
      %33 = arith.andi %29, %32 : vector<8x128xi32>
      %c0_i32_19 = arith.constant 0 : i32
      %34 = vector.broadcast %c0_i32_19 : i32 to vector<8x128xi32>
      %35 = arith.cmpi ne, %33, %34 : vector<8x128xi32>
      %cst_20 = arith.constant 1.250000e+00 : f32
      %36 = vector.broadcast %cst_20 : f32 to vector<8x128xf32>
      %37 = arith.mulf %26, %36 : vector<8x128xf32>
      %cst_21 = arith.constant 0.000000e+00 : f32
      %38 = vector.broadcast %cst_21 : f32 to vector<8x128xf32>
      %39 = arith.select %35, %37, %38 : vector<8x128xi1>, vector<8x128xf32>
      %c0_22 = arith.constant 0 : index
      %c0_23 = arith.constant 0 : index
      %40 = vector.load %arg10[%c0_22, %c0_23] : memref<1x128xf32, #tpu.memory_space<vmem>>, vector<1x128xf32>
      %cst_24 = arith.constant dense<0.000000e+00> : vector<128xf32>
      %41 = vector.multi_reduction <add>, %39, %cst_24 [0] : vector<8x128xf32> to vector<128xf32>
      %42 = vector.shape_cast %41 : vector<128xf32> to vector<1x128xf32>
      %43 = arith.addf %40, %42 : vector<1x128xf32>
      %c0_25 = arith.constant 0 : index
      %c0_26 = arith.constant 0 : index
      %44 = vector.load %arg10[%c0_25, %c0_26] : memref<1x128xf32, #tpu.memory_space<vmem>>, vector<1x128xf32>
      tpu.vector_store %arg10[%c0_25, %c0_26], %43 {strides = array<i32>} : memref<1x128xf32, #tpu.memory_space<vmem>>, vector<1x128xf32>,
      %c0_27 = arith.constant 0 : index
      %c0_28 = arith.constant 0 : index
      %45 = vector.load %arg11[%c0_27, %c0_28] : memref<1x128xf32, #tpu.memory_space<vmem>>, vector<1x128xf32>
      %46 = arith.mulf %39, %39 : vector<8x128xf32>
      %cst_29 = arith.constant dense<0.000000e+00> : vector<128xf32>
      %47 = vector.multi_reduction <add>, %46, %cst_29 [0] : vector<8x128xf32> to vector<128xf32>
      %48 = vector.shape_cast %47 : vector<128xf32> to vector<1x128xf32>
      %49 = arith.addf %45, %48 : vector<1x128xf32>
      %c0_30 = arith.constant 0 : index
      %c0_31 = arith.constant 0 : index
      %50 = vector.load %arg11[%c0_30, %c0_31] : memref<1x128xf32, #tpu.memory_space<vmem>>, vector<1x128xf32>
      tpu.vector_store %arg11[%c0_30, %c0_31], %49 {strides = array<i32>} : memref<1x128xf32, #tpu.memory_space<vmem>>, vector<1x128xf32>,
      %c8_i32 = arith.constant 8 : i32
      %51 = arith.muli %arg1, %c8_i32 : i32
      %52 = tpu.assume_multiple %51, 8 : i32
      %53 = arith.index_cast %52 : i32 to index
      %c0_32 = arith.constant 0 : index
      %54 = vector.load %arg14[%53, %c0_32] : memref<24x128xf32, #tpu.memory_space<vmem>>, vector<8x128xf32>
      tpu.vector_store %arg14[%53, %c0_32], %39 {strides = array<i32>} : memref<24x128xf32, #tpu.memory_space<vmem>>, vector<8x128xf32>,
    } else {
    }
    %c1_i32 = arith.constant 1 : i32
    %8 = arith.cmpi eq, %arg0, %c1_i32 : i32
    %c0_i32_4 = arith.constant 0 : i32
    %9 = arith.cmpi eq, %arg1, %c0_i32_4 : i32
    %10 = arith.andi %8, %9 : i1
    %11 = arith.extui %10 : i1 to i32
    %c0_i32_5 = arith.constant 0 : i32
    %12 = arith.cmpi ne, %11, %c0_i32_5 : i32
    scf.if %12 {
      %c0 = arith.constant 0 : index
      %c0_8 = arith.constant 0 : index
      %16 = vector.load %arg10[%c0, %c0_8] : memref<1x128xf32, #tpu.memory_space<vmem>>, vector<1x128xf32>
      %cst = arith.constant 5.000000e-02 : f32
      %17 = vector.broadcast %cst : f32 to vector<1x128xf32>
      %18 = arith.mulf %16, %17 : vector<1x128xf32>
      %c0_9 = arith.constant 0 : index
      %c0_10 = arith.constant 0 : index
      %19 = vector.load %arg11[%c0_9, %c0_10] : memref<1x128xf32, #tpu.memory_space<vmem>>, vector<1x128xf32>
      %cst_11 = arith.constant 5.000000e-02 : f32
      %20 = vector.broadcast %cst_11 : f32 to vector<1x128xf32>
      %21 = arith.mulf %19, %20 : vector<1x128xf32>
      %22 = arith.mulf %18, %18 : vector<1x128xf32>
      %23 = arith.subf %21, %22 : vector<1x128xf32>
      %cst_12 = arith.constant 0.000000e+00 : f32
      %24 = vector.broadcast %cst_12 : f32 to vector<1x128xf32>
      %25 = arith.maximumf %23, %24 : vector<1x128xf32>
      %cst_13 = arith.constant 9.99999974E-6 : f32
      %26 = vector.broadcast %cst_13 : f32 to vector<1x128xf32>
      %27 = arith.addf %25, %26 : vector<1x128xf32>
      %28 = math.rsqrt %27 : vector<1x128xf32>
      %c0_14 = arith.constant 0 : index
      %c0_15 = arith.constant 0 : index
      %29 = vector.load %arg7[%c0_14, %c0_15] : memref<1x128xf32, #tpu.memory_space<vmem>>, vector<1x128xf32>
      %30 = arith.mulf %29, %28 : vector<1x128xf32>
      %c0_16 = arith.constant 0 : index
      %c0_17 = arith.constant 0 : index
      %31 = vector.load %arg12[%c0_16, %c0_17] : memref<1x128xf32, #tpu.memory_space<vmem>>, vector<1x128xf32>
      tpu.vector_store %arg12[%c0_16, %c0_17], %30 {strides = array<i32>} : memref<1x128xf32, #tpu.memory_space<vmem>>, vector<1x128xf32>,
      %c0_18 = arith.constant 0 : index
      %c0_19 = arith.constant 0 : index
      %32 = vector.load %arg8[%c0_18, %c0_19] : memref<1x128xf32, #tpu.memory_space<vmem>>, vector<1x128xf32>
      %c0_20 = arith.constant 0 : index
      %c0_21 = arith.constant 0 : index
      %33 = vector.load %arg12[%c0_20, %c0_21] : memref<1x128xf32, #tpu.memory_space<vmem>>, vector<1x128xf32>
      %34 = arith.mulf %18, %33 : vector<1x128xf32>
      %35 = arith.subf %32, %34 : vector<1x128xf32>
      %c0_22 = arith.constant 0 : index
      %c0_23 = arith.constant 0 : index
      %36 = vector.load %arg13[%c0_22, %c0_23] : memref<1x128xf32, #tpu.memory_space<vmem>>, vector<1x128xf32>
      tpu.vector_store %arg13[%c0_22, %c0_23], %35 {strides = array<i32>} : memref<1x128xf32, #tpu.memory_space<vmem>>, vector<1x128xf32>,
    } else {
    }
    %c1_i32_6 = arith.constant 1 : i32
    %13 = arith.cmpi eq, %arg0, %c1_i32_6 : i32
    %14 = arith.extui %13 : i1 to i32
    %c0_i32_7 = arith.constant 0 : i32
    %15 = arith.cmpi ne, %14, %c0_i32_7 : i32
    scf.if %15 {
      %c8_i32 = arith.constant 8 : i32
      %16 = arith.muli %arg1, %c8_i32 : i32
      %17 = tpu.assume_multiple %16, 8 : i32
      %18 = arith.index_cast %17 : i32 to index
      %c0 = arith.constant 0 : index
      %19 = vector.load %arg14[%18, %c0] : memref<24x128xf32, #tpu.memory_space<vmem>>, vector<8x128xf32>
      %c0_8 = arith.constant 0 : index
      %c0_9 = arith.constant 0 : index
      %20 = vector.load %arg12[%c0_8, %c0_9] : memref<1x128xf32, #tpu.memory_space<vmem>>, vector<1x128xf32>
      %21 = vector.broadcast %20 : vector<1x128xf32> to vector<8x128xf32>
      %22 = arith.mulf %19, %21 : vector<8x128xf32>
      %c0_10 = arith.constant 0 : index
      %c0_11 = arith.constant 0 : index
      %23 = vector.load %arg13[%c0_10, %c0_11] : memref<1x128xf32, #tpu.memory_space<vmem>>, vector<1x128xf32>
      %24 = vector.broadcast %23 : vector<1x128xf32> to vector<8x128xf32>
      %25 = arith.addf %22, %24 : vector<8x128xf32>
      %c0_12 = arith.constant 0 : index
      %c0_13 = arith.constant 0 : index
      %26 = vector.load %arg9[%c0_12, %c0_13] : memref<8x128xf32, #tpu.memory_space<vmem>>, vector<8x128xf32>
      tpu.vector_store %arg9[%c0_12, %c0_13], %25 {strides = array<i32>} : memref<8x128xf32, #tpu.memory_space<vmem>>, vector<8x128xf32>,
    } else {
    }
    return
  }
  func.func @transform_0(%arg0: i32, %arg1: i32) -> (i32, i32) {
    %c1_i32 = arith.constant 1 : i32
    %0 = arith.subi %c1_i32, %arg0 : i32
    %1 = arith.muli %arg1, %0 : i32
    %c0_i32 = arith.constant 0 : i32
    %c0_i32_0 = arith.constant 0 : i32
    return %1, %c0_i32 : i32, i32
  }
  func.func @transform_1(%arg0: i32, %arg1: i32) -> (i32, i32) {
    %c1_i32 = arith.constant 1 : i32
    %0 = arith.subi %c1_i32, %arg0 : i32
    %1 = arith.muli %arg1, %0 : i32
    %c0_i32 = arith.constant 0 : i32
    %c0_i32_0 = arith.constant 0 : i32
    return %1, %c0_i32 : i32, i32
  }
  func.func @transform_2(%arg0: i32, %arg1: i32) -> (i32, i32) {
    %c0_i32 = arith.constant 0 : i32
    %c0_i32_0 = arith.constant 0 : i32
    %c0_i32_1 = arith.constant 0 : i32
    return %c0_i32, %c0_i32_0 : i32, i32
  }
  func.func @transform_3(%arg0: i32, %arg1: i32) -> (i32, i32) {
    %c0_i32 = arith.constant 0 : i32
    %c0_i32_0 = arith.constant 0 : i32
    %c0_i32_1 = arith.constant 0 : i32
    return %c0_i32, %c0_i32_0 : i32, i32
  }
  func.func @transform_4(%arg0: i32, %arg1: i32) -> (i32, i32) {
    %c0_i32 = arith.constant 0 : i32
    %c0_i32_0 = arith.constant 0 : i32
    %c0_i32_1 = arith.constant 0 : i32
    return %c0_i32, %c0_i32_0 : i32, i32
  }
  func.func @transform_5(%arg0: i32, %arg1: i32) -> (i32, i32) {
    %c0_i32 = arith.constant 0 : i32
    %c0_i32_0 = arith.constant 0 : i32
    %c0_i32_1 = arith.constant 0 : i32
    return %c0_i32, %c0_i32_0 : i32, i32
  }
  func.func @transform_6(%arg0: i32, %arg1: i32) -> (i32, i32) {
    %c0_i32 = arith.constant 0 : i32
    %c0_i32_0 = arith.constant 0 : i32
    %c0_i32_1 = arith.constant 0 : i32
    return %c0_i32, %c0_i32_0 : i32, i32
  }
  func.func @transform_7(%arg0: i32, %arg1: i32) -> (i32, i32) {
    %0 = arith.muli %arg1, %arg0 : i32
    %c0_i32 = arith.constant 0 : i32
    %c0_i32_0 = arith.constant 0 : i32
    return %0, %c0_i32 : i32, i32
  }
}

</mosaic_0001>

<bundles_post_ra>
// kernel: tpu_custom_call.1
= control target key start
LH: loop header
LB: loop body
LE: loop exit
PB: predicated region body
PF: predicated region fallthrough
CT: control target
= control target key end

     0   :  { %12 = vsyncpa [#allocation8], 0  ;;  %s1039_s0 = inlined_call_operand.vmem [shape: f32[24,16], index: 0, kind: input, shape index: {}]   ;;  %s1040_s1 = inlined_call_operand.vmem [shape: s32[24,1], index: 1, kind: input, shape index: {}]   ;;  %s1041_s2 = inlined_call_operand.vmem [shape: s32[1,128], index: 2, kind: input, shape index: {}]   ;;  %s1042_s3 = inlined_call_operand.vmem [shape: f32[16,128], index: 3, kind: input, shape index: {}]   ;;  %s1043_s4 = inlined_call_operand.vmem [shape: f32[1,128], index: 4, kind: input, shape index: {}]   ;;  %s1044_s5 = inlined_call_operand.vmem [shape: f32[1,128], index: 5, kind: input, shape index: {}]   ;;  %s1045_s6 = inlined_call_operand.vmem [shape: f32[1,128], index: 6, kind: input, shape index: {}]   ;;  %s1046_s7 = inlined_call_operand.hbm [shape: f32[24,128], index: 7, kind: output, shape index: {}]  }
   0x1   :  { %14 = vsyncpa [#allocation8 + $0x1], 0  ;;  %s868_s24 = smov 0   ;;  %s870_s25 = smov 0  }
   0x2   :  { %s872_s26 = smov 0   ;;  %s874_s27 = smov 0  }
   0x3   :  { %s876_s28 = smov 0   ;;  %s878_s29 = smov 0  }
   0x4   :  { %s880_s30 = smov 0   ;;  %s882_s8 = smov 0  }
   0x5 LB: > { %s613_s9 = sadd.s32 4294967295, %s820_s8   ;;  %s614_s10 = sadd.s32 4294967294, %s820_s8   ;;  %s820_s8 = sphi %s882_s8, %s20_s8   ;;  %s816_s30 = sphi %s880_s30, %s1063_s30   ;;  %s812_s29 = sphi %s878_s29, %s1062_s29   ;;  %s808_s28 = sphi %s876_s28, %s1061_s28   ;;  %s804_s27 = sphi %s874_s27, %s1060_s27   ;;  %s800_s26 = sphi %s872_s26, %s1059_s26   ;;  %s796_s25 = sphi %s870_s25, %s1058_s25   ;;  %s792_s24 = sphi %s868_s24, %s1057_s24  }
   0x6   : > { %s29_s11 = sadd.s32 1, %s812_s29  ;;  %s32_s12 = sadd.s32 1, %s816_s30 }
   0x7   : > { %p30_p0 = scmp.ge.s32.totalorder %s29_s11, 3  ;;  %s201_s13 = smul.u32 %s812_s29, %s816_s30 }
   0x8   : > { %p216_p1 = scmp.ne.s32.totalorder %s800_s26, %s796_s25  ;;  %p217_p2 = scmp.eq.s32.totalorder %s613_s9, 5 }
   0x9   : > { %s1065_s11 = smov (%p30_p0, %s29_s11), 0  ;;  %s1067_s12 = smov (!%p30_p0, %s32_s12), %s816_s30 }
   0xa   : > { %1050 = sst [smem:[#allocation10_spill]] %s1065_s11  ;;  %p222_p3 = scmp.ne.s32.totalorder %s796_s25, %s792_s24 }
   0xb   : > { %p34_p4 = scmp.ge.s32.totalorder %s1067_s12, 2  ;;  %p223_p5 = scmp.eq.s32.totalorder %s614_s10, 5 }
   0xc   : > { %p921_p6 = por %p217_p2, %p216_p1  ;;  %p617_p7 = scmp.ge.s32.totalorder %s820_s8, 1 }
   0xd   : > { %s1069_s12 = smov (%p34_p4, %s1067_s12), 0  ;;  %p928_p8 = por %p223_p5, %p222_p3 }
   0xe   : > { %1052 = sst [smem:[#allocation11_spill]] %s1069_s12  ;;  %p278_p9 = scmp.lt.s32.totalorder %s820_s8, 7 }
   0xf   : > { %s202_s16 = smul.u32 %s1069_s12, %s1065_s11  ;;  %s206_s18 = sadd.s32 1, %s800_s26 }
  0x10   : > { %p279_p10 = pnand %p617_p7, %p278_p9 }
  0x11   : > { %s203_s17 = ssub.s32 %s201_s13, %s202_s16  ;;  %s1049_s20 = sand.u32 (!%p279_p10), 1, %s796_s25  }
  0x12   : > { %p204_p11 = scmp.eq.s32.totalorder %s203_s17, 0  ;;  %282 = sbr.rel (%p279_p10) target bundleno = 354 (0x162), region = 48 }
  0x13   : > { %s317_s21 = ssub.s32 (!%p279_p10), 1, %s808_s28  ;;  %s943_s22 = sshll.u32 (!%p279_p10), %s1049_s20, 3 }
  0x14   : > { %s937_s19 = scalar_select %p204_p11, %s800_s26, %s206_s18  }
  0x15   : > { %s318_s23 = smul.u32 (!%p279_p10), %s804_s27, %s317_s21  ;;  %p334_p12 = scmp.eq.s32.totalorder (!%p279_p10), %s808_s28, 0 }
  0x16   : > { %p335_p0 = scmp.eq.s32.totalorder (!%p279_p10), %s804_s27, 0  ;;  %s316_s11 = scalar_lea.vmem (!%p279_p10), [#allocation7], %s943_s22 }
  0x17   : > { %p319_p13 = scmp.lt.s32.totalorder (!%p279_p10), %s318_s23, 2 }
  0x18   : > { %p336_p1 = pnand (!%p279_p10), %p335_p0, %p334_p12 }
  0x19   : > { %s1071_s23 = smov (!%p319_p13, %s318_s23), 2  ;;  %v822_v0 = vmov (!%p336_p1), 0.0  }
  0x1a   : > { %s619_s9 = sshll.u32 %s1071_s23, 3  ;;  %339 = sbr.rel (%p336_p1) target bundleno = 33 (0x21), region = 52  ;;  %340 = vst [vmem:[#allocation2] sm:$0x1] (!%p336_p1), %v822_v0  ;;  %341 = vst [vmem:[#allocation3] sm:$0x1] (!%p336_p1), %v822_v0 }
  0x1b   : > { %s322_s16 = scalar_lea.vmem %s1039_s0, %s619_s9  ;;  %s330_s12 = scalar_lea.vmem %s1040_s1, %s619_s9 }
  0x21 PF: > { %p621_p2 = scmp.ne.s32.totalorder %s808_s28, 0 }
  0x22   : > { %v346_v1 = vld [vmem:[%s1042_s3] sm:$0xff] (!%p621_p2)  ;;  %v347_v2 = vld [vmem:[%s1042_s3 + $0x8] sm:$0xff] (!%p621_p2)  ;;  %v823_v3 = vmov (!%p621_p2), 0.0|0.0   ;;  %vm824_vm0 = vmmov (!%p621_p2), 0   ;;  %v825_v5 = vmov (!%p621_p2), 0.0   ;;  %v826_v7 = vmov (!%p621_p2), 0  }
  0x23   : > { %344 = sbr.rel (%p621_p2) target bundleno = 277 (0x115), region = 56  ;;  %644 = vmatprep.subr.bf16.mxu0 (!%p621_p2), %v823_v3  ;;  %v645_v4 = vpack.c.bf16 (!%p621_p2), %v347_v2, %v346_v1  ;;  %641 = vmatprep.mubr.msk.f32.mxu0 (!%p621_p2), %vm824_vm0, %v825_v5  ;;  %v432_v6 = vld [vmem:[%s330_s12] sm:$0xff] (!%p621_p2)  ;;  %vm355_vm1 = vcmask (!%p621_p2), 130048   ;;  %s625_s12 = sshll.u32 (!%p621_p2), %s804_s27, 3  ;;  %v445_v30 = vld [vmem:[#allocation2] sm:$0x1] (!%p621_p2) }
  0x24   : > { %723 = vset.pattern.permute.xlu0 (!%p621_p2), %v826_v7  ;;  %v345_v8 = vld [vmem:[%s322_s16] sm:$0xff] (!%p621_p2)  ;;  %s465_s16 = scalar_lea.vmem (!%p621_p2), [#allocation6], %s625_s12  ;;  %v454_v33 = vld [vmem:[#allocation3] sm:$0x1] (!%p621_p2) }
  0x25   : > { %646 = vmatpush3.bf16.msra.mxu0 (!%p621_p2), %v645_v4  ;;  %434 = vperm.xlu0 (!%p621_p2), %723, %v432_v6   ;;  %v622_v9 = vld [vmem:[%s1043_s4] ss:$0 sm:$0xff] (!%p621_p2) }
  0x26   : > { %v624_v10 = vld [vmem:[%s1041_s2] ss:$0 sm:$0xff] (!%p621_p2) }
  0x28   : > { %642 = vmatmul.mubr.msk.f32.vlgmr.msra.gmra.mrb[0].mxu0 (!%p621_p2), %vm355_vm1, %v345_v8 }
  0xa4   : > { %v435_v11 = vpop.permute.xlu0 %434 }
  0xa5   : > { %v441_v15 = vand.u32 %v624_v10, %v435_v11 }
  0xa7   : > { %vm442_vm3 = vcmp.ne.s32.totalorder %v441_v15, 0 }
  0xfb   : > { %v425_v12 = vpop.f32.mrb[0].mxu0 }
  0xfc   : > { %v426_v13 = vadd.f32 %v622_v9, %v425_v12  ;;  %v643_v14 = vpop.f32.mrb[1].mxu0 }
  0xfe   : > { %vm429_vm2 = vcmp.gt.f32.partialorder %v426_v13, 0.0  ;;  %v430_v16 = vmul.f32 0.01, %v426_v13 }
 0x100   : > { %v431_v17 = vsel %vm429_vm2, %v426_v13, %v430_v16 }
 0x101   : > { %v443_v18 = vmul.f32 1.25, %v431_v17 }
 0x103   : > { %v444_v19 = vsel %vm442_vm3, %v443_v18, 0.0 }
 0x104   : > { %v446_v20 = vrot.slane %v444_v19, 4  ;;  %v455_v21 = vmul.f32 %v444_v19, %v444_v19  ;;  %466 = vst [vmem:[%s465_s16] sm:$0xff] %v444_v19 }
 0x106   : > { %v447_v22 = vadd.f32 %v446_v20, %v444_v19  ;;  %v456_v23 = vrot.slane %v455_v21, 4 }
 0x108   : > { %v448_v24 = vrot.slane %v447_v22, 2  ;;  %v457_v25 = vadd.f32 %v456_v23, %v455_v21 }
 0x10a   : > { %v449_v26 = vadd.f32 %v448_v24, %v447_v22  ;;  %v458_v27 = vrot.slane %v457_v25, 2 }
 0x10c   : > { %v450_v28 = vrot.slane %v449_v26, 1  ;;  %v459_v29 = vadd.f32 %v458_v27, %v457_v25 }
 0x10e   : > { %v451_v31 = vadd.f32 %v450_v28, %v449_v26  ;;  %v460_v32 = vrot.slane %v459_v29, 1 }
 0x110   : > { %v452_v34 = vadd.f32 %v451_v31, %v445_v30  ;;  %v461_v35 = vadd.f32 %v460_v32, %v459_v29 }
 0x112   : > { %453 = vst [vmem:[#allocation2] sm:$0x1] %v452_v34  ;;  %v462_v36 = vadd.f32 %v461_v35, %v454_v33 }
 0x114   : > { %463 = vst [vmem:[#allocation3] sm:$0x1] %v462_v36 }
 0x115 PF: > { %p467_p3 = scmp.eq.s32.totalorder %s808_s28, 1 }
 0x117   : > { %p468_p4 = pnand %p467_p3, %p335_p0 }
 0x118   : > { %v481_v45 = vld [vmem:[%s1044_s5] sm:$0x1] (!%p468_p4) }
 0x119   : > { %471 = sbr.rel (%p468_p4) target bundleno = 318 (0x13e), region = 60  ;;  %v472_v37 = vld [vmem:[#allocation2] sm:$0x1] (!%p468_p4)  ;;  %v484_v48 = vld [vmem:[%s1045_s6] sm:$0x1] (!%p468_p4) }
 0x11a   : > { %v473_v39 = vmul.f32 (!%p468_p4), 0.05, %v472_v37 }
 0x11b   : > { %v474_v38 = vld [vmem:[#allocation3] sm:$0x1] (!%p468_p4) }
 0x11c   : > { %v475_v40 = vmul.f32 (!%p468_p4), 0.05, %v474_v38  ;;  %v476_v41 = vmul.f32 (!%p468_p4), %v473_v39, %v473_v39 }
 0x11e   : > { %v477_v42 = vsub.f32 (!%p468_p4), %v475_v40, %v476_v41 }
 0x120   : > { %v478_v43 = vmax.f32 %v477_v42, 0.0 }
 0x122   : > { %v479_v44 = vadd.f32 1e-05, %v478_v43 }
 0x124   : > { %724 = vrsqrt.f32 %v479_v44 }
 0x12e   : > { %v725_v46 = vpop.eup %724 }
 0x12f   : > { %v482_v47 = vmul.f32 %v725_v46, %v481_v45 }
 0x131   : > { %483 = vst [vmem:[#allocation4] sm:$0x1] %v482_v47 }
 0x138   : > { %v485_v49 = vld [vmem:[#allocation4] sm:$0x1] }
 0x139   : > { %v486_v50 = vmul.f32 %v485_v49, %v473_v39 }
 0x13b   : > { %v487_v51 = vsub.f32 %v484_v48, %v486_v50 }
 0x13d   : > { %488 = vst [vmem:[#allocation5] sm:$0x1] %v487_v51 }
 0x13e PF: > { %p626_p5 = scmp.ne.s32.totalorder %s808_s28, 1 }
 0x13f   : > { %s627_s20 = sshll.u32 (!%p626_p5), %s804_s27, 3  ;;  %v628_v52 = vld [vmem:[#allocation4] ss:$0 sm:$0xff] (!%p626_p5) }
 0x140   : > { %491 = sbr.rel (%p626_p5) target bundleno = 328 (0x148), region = 64  ;;  %s493_s9 = scalar_lea.vmem (!%p626_p5), [#allocation6], %s627_s20 }
 0x141   : > { %v494_v53 = vld [vmem:[%s493_s9] sm:$0xff] (!%p626_p5) }
 0x142   : > { %v502_v55 = vmul.f32 (!%p626_p5), %v628_v52, %v494_v53 }
 0x144   : > { %v629_v54 = vld [vmem:[#allocation5] ss:$0 sm:$0xff] (!%p626_p5) }
 0x145   : > { %v510_v56 = vadd.f32 (!%p626_p5), %v629_v54, %v502_v55 }
 0x147   : > { %511 = vst [vmem:[%s316_s11] sm:$0xff] %v510_v56 }
 0x148 PF: > { %s520_s13 = smul.u32 %s804_s27, %s808_s28  ;;  %s527_s17 = sshll.u32 %s316_s11, 4  ;;  %s988_s17 = int_to_ptr.vmem [resolvable:$true] %s527_s17 }
 0x149   : > { %s1054_s23 = sand.u32 1, %s796_s25   ;;  %s726_s20 = scalar_lea.vmem %s988_s17, 128 }
 0x14a   : > { %s631_s12 = sshll.u32 %s520_s13, 7  ;;  %s513_s10 = scalar_lea.sflag [#allocation8], %s1054_s23 }
 0x14b   : > { %s525_s21 = scalar_lea.hbm %s1046_s7, %s631_s12  ;;  %p727_p7 = scmp.ne.s32.totalorder %s988_s17, %s726_s20 }
 0x14c   : > { %s827_s27 = smov [#allocation7]  }
 0x14d   : > { %p728_p9 = pnand %p727_p7, %p921_p6  ;;  %s730_s28 = sshll.u32 %s827_s27, 4  ;;  %s731_s28 = int_to_ptr.vmem [resolvable:$false] %s730_s28 }
 0x14e   : > { %s732_s11 = scalar_lea.vmem %s731_s28, 256  ;;  %p733_p11 = scmp.lt.s32.totalorder %s988_s17, %s731_s28 }
 0x14f   : > { %p729_p10 = pneg %p728_p9  ;;  %p734_p12 = scmp.lt.s32.totalorder %s732_s11, %s726_s20 }
 0x151   : > { %p735_p13 = por %p734_p12, %p733_p11 }
 0x153   : > { %p736_p0 = pnand %p735_p13, %p729_p10 }
 0x155   : > { %739 = shalt.err (!%p736_p0)
}
 0x156   : > { %s740_s22 = scalar_lea.hbm %s525_s21, 128  ;;  %s744_s12 = scalar_lea.hbm %s1046_s7, 384 }
 0x157   : > { %p741_p1 = scmp.ne.s32.totalorder %s525_s21, %s740_s22  ;;  %p745_p4 = scmp.lt.u32.totalorder %s525_s21, %s1046_s7 }
 0x158   : > { %p746_p5 = scmp.lt.u32.totalorder %s744_s12, %s740_s22  ;;  %p748_p9 = scmp.lt.u32.totalorder %s740_s22, %s525_s21 }
 0x159   : > { %p742_p2 = pnand %p741_p1, %p921_p6 }
 0x15a   : > { %p747_p7 = por %p746_p5, %p745_p4 }
 0x15b   : > { %p743_p3 = pneg %p742_p2 }
 0x15c   : > { %p749_p11 = por %p748_p9, %p747_p7 }
 0x15e   : > { %p750_p10 = pnand %p749_p11, %p743_p3 }
 0x160   : > { %753 = shalt.err (!%p750_p10)
}
 0x161   : > { %647 = dma.vmem_to_hbm [thread:$0]  (%p921_p6), %s988_s17, 128, %s525_s21, %s513_s10  }
 0x162 PF: > { %p653_p12 = scmp.ge.s32.totalorder %s820_s8, 2  ;;  %s539_s23 = sand.u32 1, %s792_s24  }
 0x163   : > { %s540_s20 = scalar_lea.sflag [#allocation8], %s539_s23 }
 0x164   : > { %p650_p13 = pnand %p653_p12, %p928_p8 }
 0x166   : > { %787 = dma.done.wait (!%p650_p13), %s540_s20, 128  }
 0x167   : > { %789 = vsyncadd (!%p650_p13), %s540_s20, 4294967168  ;;  %s20_s8 = sadd.s32 1, %s820_s8   ;;  %s1055_s14 = sld [smem:[#allocation10_spill]] }
 0x168   : > { %p17_p0 = scmp.ge.s32.totalorder %s20_s8, 8   ;;  %s1056_s17 = sld [smem:[#allocation11_spill]] }
 0x169   : > { %s1057_s24 = smov %s796_s25  ;;  %s1058_s25 = smov %s800_s26 }
 0x16a   : > { %s1059_s26 = smov %s937_s19  ;;  %s1060_s27 = smov %s812_s29 }
 0x16b   : > { %s1061_s28 = smov %s816_s30  ;;  %19 = sbr.rel (!%p17_p0) target bundleno = 5 (0x5), region = 104 }
 0x16d   : > { %s1062_s29 = smov %s1055_s14 }
 0x16e   : > { %s1063_s30 = smov %s1056_s17 }
 0x172   :  { %545 = vsyncpa [#allocation8], 1 }
 0x173   :  { %547 = vsyncpa [#allocation8 + $0x1], 1 }

</bundles_post_ra>
